<compile_context>
chip_gen: v7x
topology: tpu7x:2x2x1
jax: 0.10.0
libtpu: 0.0.40
codegen_flags: <defaults>
</compile_context>

<pallas_src>
import math
import jax
import jax.numpy as jnp
from jax.experimental import pallas as pl
from jax.experimental.pallas import tpu as pltpu

NOISE_SIZE = 32
KGE_SIZE = 32
PATTERN_NUM = 32
HOURS_IN_DAY = 24          # hours_in_day.shape[1]
PATTERN_LEN = 120          # days_in_weekday_residual_patterns.shape[1] (5 weekdays * 24 h)
LN_EPS = 1e-5
INV_SQRT2 = 0.7071067811865476


def generator_dw_sum_kernel(xt_ref, w_ref, b_ref, g1_ref, be1_ref,
                            patt_ref, g2_ref, be2_ref, hrs_ref, o_ref):
    xt = xt_ref[...].astype(jnp.float32)                       # (Din, tb), batch on lanes

    # Linear(64 -> P): h^T = W @ x^T + b   -> (P, tb)
    h = jax.lax.dot_general(w_ref[...], xt, (((1,), (0,)), ((), ())),
                            preferred_element_type=jnp.float32)
    h = h + b_ref[...]                                         # (P,1) broadcast over lanes

    # LayerNorm over pattern_num (feature axis == sublane axis 0 here).
    mu1 = jnp.mean(h, axis=0, keepdims=True)
    var1 = jnp.mean(jnp.square(h - mu1), axis=0, keepdims=True)
    hn = (h - mu1) * jax.lax.rsqrt(var1 + LN_EPS) * g1_ref[...] + be1_ref[...]

    # Softmax over pattern_num (PyTorch dim=1 of a (B, P) tensor).
    m = jnp.max(hn, axis=0, keepdims=True)
    e = jnp.exp(hn - m)
    inv = pl.reciprocal(jnp.sum(e, axis=0, keepdims=True), approx=False)
    sm = e * inv

    # Mix pattern bank: y^T = patterns^T @ p^T  -> (L, tb)
    yt = jax.lax.dot_general(patt_ref[...], sm, (((1,), (0,)), ((), ())),
                             preferred_element_type=jnp.float32)

    # LayerNorm over pattern length L (sublane axis 0).
    mu2 = jnp.mean(yt, axis=0, keepdims=True)
    var2 = jnp.mean(jnp.square(yt - mu2), axis=0, keepdims=True)
    yn = (yt - mu2) * jax.lax.rsqrt(var2 + LN_EPS) * g2_ref[...] + be2_ref[...]

    # Residual: hours_in_day tiled along the feature axis (torch .repeat(1, L//H)).
    hrs = hrs_ref[...].astype(jnp.float32)                     # (H, tb)
    rep = o_ref.shape[0] // hrs.shape[0]
    tiled = jnp.concatenate([hrs] * rep, axis=0) if rep > 1 else hrs
    dw = yn + tiled

    # Exact (erf) GELU — PyTorch nn.GELU default.
    o_ref[...] = 0.5 * dw * (1.0 + jax.lax.erf(dw * INV_SQRT2))


def _pick_batch_tile(B):
    # Biggest lane-dense tile that still leaves >= 2 parallel grid steps (v7x 2 TCs).
    for cand in (1024, 512, 256, 128):
        if B % cand == 0 and B // cand >= 2:
            return cand
    return B   # single full-batch step; block dim == full array dim is always legal


def generator_dw_sum_forward(x, w, b, g1, be1, patterns, g2, be2, hours_in_day, *, tb=None):
    B, Din = x.shape
    P, L = patterns.shape
    H = hours_in_day.shape[1]
    assert L % H == 0, "pattern length must be a multiple of hours_in_day width"
    if tb is None:
        tb = _pick_batch_tile(B)
    assert B % tb == 0 and (tb % 128 == 0 or tb == B)

    # Feature-major (lane-dense) operands — wrapper-side layout plumbing only.
    xt = x.T                      # (Din, B)
    hrs_t = hours_in_day.T        # (H, B)
    patt = patterns.T             # (L, P)

    cost = pl.CostEstimate(
        flops=2 * B * (Din * P + P * L) + 12 * B * (P + L),
        transcendentals=B * (P + L + 2),
        bytes_accessed=4 * (B * (Din + H + L) + P * Din + P * L + 3 * P + 2 * L),
    )

    out_t = pl.pallas_call(
        generator_dw_sum_kernel,
        out_shape=jax.ShapeDtypeStruct((L, B), jnp.float32),
        grid=(B // tb,),
        in_specs=[
            pl.BlockSpec((Din, tb), lambda i: (0, i)),   # x^T tile (batch on lanes)
            pl.BlockSpec((P, Din), lambda i: (0, 0)),    # W (full)
            pl.BlockSpec((P, 1), lambda i: (0, 0)),      # bias
            pl.BlockSpec((P, 1), lambda i: (0, 0)),      # LN1 gamma
            pl.BlockSpec((P, 1), lambda i: (0, 0)),      # LN1 beta
            pl.BlockSpec((L, P), lambda i: (0, 0)),      # patterns^T (full)
            pl.BlockSpec((L, 1), lambda i: (0, 0)),      # LN2 gamma
            pl.BlockSpec((L, 1), lambda i: (0, 0)),      # LN2 beta
            pl.BlockSpec((H, tb), lambda i: (0, i)),     # hours_in_day^T tile
        ],
        out_specs=pl.BlockSpec((L, tb), lambda i: (0, i)),
        compiler_params=pltpu.CompilerParams(dimension_semantics=("parallel",)),
        cost_estimate=cost,
    )(xt, w, b.reshape(P, 1), g1.reshape(P, 1), be1.reshape(P, 1),
      patt, g2.reshape(L, 1), be2.reshape(L, 1), hrs_t)

    return out_t.T    # back to (B, L) to match the PyTorch module


def reference_forward(x, w, b, g1, be1, patterns, g2, be2, hours_in_day):
    h = x @ w.T + b
    mu = h.mean(-1, keepdims=True)
    var = ((h - mu) ** 2).mean(-1, keepdims=True)
    hn = (h - mu) / jnp.sqrt(var + LN_EPS) * g1 + be1
    sm = jax.nn.softmax(hn, axis=1)
    y = sm @ patterns
    mu2 = y.mean(-1, keepdims=True)
    var2 = ((y - mu2) ** 2).mean(-1, keepdims=True)
    yn = (y - mu2) / jnp.sqrt(var2 + LN_EPS) * g2 + be2
    rep = patterns.shape[1] // hours_in_day.shape[1]
    dw = yn + jnp.tile(hours_in_day, (1, rep))
    return jax.nn.gelu(dw, approximate=False)


if __name__ == "__main__":
    key = jax.random.PRNGKey(0)
    k_x, k_w, k_b, k_p, k_g1, k_b1, k_g2, k_b2, k_h = jax.random.split(key, 9)

    B = 256                              # small demo batch: two lane-dense tiles of 128
    Din = NOISE_SIZE + KGE_SIZE          # 64
    P = PATTERN_NUM                      # 32
    H = HOURS_IN_DAY                     # 24
    L = PATTERN_LEN                      # 120 = 5 weekdays * 24 hours

    # Deterministic synthetic parameters (PyTorch-like init ranges).
    bound = 1.0 / math.sqrt(Din)
    w = jax.random.uniform(k_w, (P, Din), jnp.float32, -bound, bound)
    b = jax.random.uniform(k_b, (P,), jnp.float32, -bound, bound)
    g1 = 1.0 + 0.1 * jax.random.normal(k_g1, (P,), jnp.float32)
    be1 = 0.05 * jax.random.normal(k_b1, (P,), jnp.float32)
    patterns = jax.random.uniform(k_p, (P, L), jnp.float32)
    g2 = 1.0 + 0.1 * jax.random.normal(k_g2, (L,), jnp.float32)
    be2 = 0.05 * jax.random.normal(k_b2, (L,), jnp.float32)

    # Inputs: x = [noise(32) | kge(32)], hours_in_day decoder output (B, 24).
    x = jax.random.normal(k_x, (B, Din), jnp.float32)
    hours_in_day = jax.random.uniform(k_h, (B, H), jnp.float32)

    out = generator_dw_sum_forward(x, w, b, g1, be1, patterns, g2, be2, hours_in_day)
    out = jax.block_until_ready(out)

    ref = reference_forward(x, w, b, g1, be1, patterns, g2, be2, hours_in_day)
    assert out.shape == (B, L)
    assert jnp.allclose(out, ref, atol=2e-5, rtol=2e-5), "mismatch vs reference"

    print("KERNEL_OK")
</pallas_src>

<mosaic_0001>
module attributes {stable_mosaic.version = 11 : i64} {
  func.func @generator_dw_sum_kernel(%arg0: i32, %arg1: memref<64x128xf32, #tpu.memory_space<vmem>>, %arg2: memref<32x64xf32, #tpu.memory_space<vmem>>, %arg3: memref<32x1xf32, #tpu.memory_space<vmem>>, %arg4: memref<32x1xf32, #tpu.memory_space<vmem>>, %arg5: memref<32x1xf32, #tpu.memory_space<vmem>>, %arg6: memref<120x32xf32, #tpu.memory_space<vmem>>, %arg7: memref<120x1xf32, #tpu.memory_space<vmem>>, %arg8: memref<120x1xf32, #tpu.memory_space<vmem>>, %arg9: memref<24x128xf32, #tpu.memory_space<vmem>>, %arg10: memref<120x128xf32, #tpu.memory_space<vmem>>) attributes {dimension_semantics = [#tpu.dimension_semantics<parallel>], iteration_bounds = array<i64: 2>, scalar_prefetch = 0 : i64, scratch_operands = 0 : i64, tpu.core_type = #tpu.core_type<tc>, window_params = [{transform_indices = @transform_0, window_bounds = array<i64: 64, 128>}, {pipeline_mode = #tpu.pipeline_mode<synchronous>, transform_indices = @transform_1, window_bounds = array<i64: 32, 64>}, {pipeline_mode = #tpu.pipeline_mode<synchronous>, transform_indices = @transform_2, window_bounds = array<i64: 32, 1>}, {pipeline_mode = #tpu.pipeline_mode<synchronous>, transform_indices = @transform_3, window_bounds = array<i64: 32, 1>}, {pipeline_mode = #tpu.pipeline_mode<synchronous>, transform_indices = @transform_4, window_bounds = array<i64: 32, 1>}, {pipeline_mode = #tpu.pipeline_mode<synchronous>, transform_indices = @transform_5, window_bounds = array<i64: 120, 32>}, {pipeline_mode = #tpu.pipeline_mode<synchronous>, transform_indices = @transform_6, window_bounds = array<i64: 120, 1>}, {pipeline_mode = #tpu.pipeline_mode<synchronous>, transform_indices = @transform_7, window_bounds = array<i64: 120, 1>}, {transform_indices = @transform_8, window_bounds = array<i64: 24, 128>}, {transform_indices = @transform_9, window_bounds = array<i64: 120, 128>}]} {
    %c0 = arith.constant 0 : index
    %c0_0 = arith.constant 0 : index
    %0 = vector.load %arg1[%c0, %c0_0] : memref<64x128xf32, #tpu.memory_space<vmem>>, vector<64x128xf32>
    %c0_1 = arith.constant 0 : index
    %c0_2 = arith.constant 0 : index
    %1 = vector.load %arg2[%c0_1, %c0_2] : memref<32x64xf32, #tpu.memory_space<vmem>>, vector<32x64xf32>
    %cst = arith.constant dense<0.000000e+00> : vector<32x128xf32>
    %2 = tpu.matmul %1, %0, %cst {dimension_numbers = #tpu.dot_dimension_numbers<[1], [0], [0], [1], [0, 0, 1, 1], [], []>} : vector<32x64xf32>, vector<64x128xf32>, vector<32x128xf32> -> vector<32x128xf32>
    %c0_3 = arith.constant 0 : index
    %c0_4 = arith.constant 0 : index
    %3 = vector.load %arg3[%c0_3, %c0_4] : memref<32x1xf32, #tpu.memory_space<vmem>>, vector<32x1xf32>
    %4 = vector.broadcast %3 : vector<32x1xf32> to vector<32x128xf32>
    %5 = arith.addf %2, %4 : vector<32x128xf32>
    %cst_5 = arith.constant dense<0.000000e+00> : vector<128xf32>
    %6 = vector.multi_reduction <add>, %5, %cst_5 [0] : vector<32x128xf32> to vector<128xf32>
    %7 = vector.shape_cast %6 : vector<128xf32> to vector<1x128xf32>
    %cst_6 = arith.constant 3.200000e+01 : f32
    %8 = vector.broadcast %cst_6 : f32 to vector<1x128xf32>
    %9 = arith.divf %7, %8 : vector<1x128xf32>
    %10 = vector.broadcast %9 : vector<1x128xf32> to vector<32x128xf32>
    %11 = arith.subf %5, %10 : vector<32x128xf32>
    %12 = arith.mulf %11, %11 : vector<32x128xf32>
    %cst_7 = arith.constant dense<0.000000e+00> : vector<128xf32>
    %13 = vector.multi_reduction <add>, %12, %cst_7 [0] : vector<32x128xf32> to vector<128xf32>
    %14 = vector.shape_cast %13 : vector<128xf32> to vector<1x128xf32>
    %cst_8 = arith.constant 3.200000e+01 : f32
    %15 = vector.broadcast %cst_8 : f32 to vector<1x128xf32>
    %16 = arith.divf %14, %15 : vector<1x128xf32>
    %17 = vector.broadcast %9 : vector<1x128xf32> to vector<32x128xf32>
    %18 = arith.subf %5, %17 : vector<32x128xf32>
    %cst_9 = arith.constant 9.99999974E-6 : f32
    %19 = vector.broadcast %cst_9 : f32 to vector<1x128xf32>
    %20 = arith.addf %16, %19 : vector<1x128xf32>
    %21 = math.rsqrt %20 : vector<1x128xf32>
    %22 = vector.broadcast %21 : vector<1x128xf32> to vector<32x128xf32>
    %23 = arith.mulf %18, %22 : vector<32x128xf32>
    %c0_10 = arith.constant 0 : index
    %c0_11 = arith.constant 0 : index
    %24 = vector.load %arg4[%c0_10, %c0_11] : memref<32x1xf32, #tpu.memory_space<vmem>>, vector<32x1xf32>
    %25 = vector.broadcast %24 : vector<32x1xf32> to vector<32x128xf32>
    %26 = arith.mulf %23, %25 : vector<32x128xf32>
    %c0_12 = arith.constant 0 : index
    %c0_13 = arith.constant 0 : index
    %27 = vector.load %arg5[%c0_12, %c0_13] : memref<32x1xf32, #tpu.memory_space<vmem>>, vector<32x1xf32>
    %28 = vector.broadcast %27 : vector<32x1xf32> to vector<32x128xf32>
    %29 = arith.addf %26, %28 : vector<32x128xf32>
    %cst_14 = arith.constant dense<0xFF800000> : vector<128xf32>
    %30 = vector.multi_reduction <maximumf>, %29, %cst_14 [0] : vector<32x128xf32> to vector<128xf32>
    %31 = vector.shape_cast %30 : vector<128xf32> to vector<1x128xf32>
    %32 = vector.broadcast %31 : vector<1x128xf32> to vector<32x128xf32>
    %33 = arith.subf %29, %32 : vector<32x128xf32>
    %34 = math.exp %33 : vector<32x128xf32>
    %cst_15 = arith.constant dense<0.000000e+00> : vector<128xf32>
    %35 = vector.multi_reduction <add>, %34, %cst_15 [0] : vector<32x128xf32> to vector<128xf32>
    %36 = vector.shape_cast %35 : vector<128xf32> to vector<1x128xf32>
    %37 = tpu.reciprocal %36 : vector<1x128xf32> -> vector<1x128xf32>
    %38 = vector.broadcast %37 : vector<1x128xf32> to vector<32x128xf32>
    %39 = arith.mulf %34, %38 : vector<32x128xf32>
    %c0_16 = arith.constant 0 : index
    %c0_17 = arith.constant 0 : index
    %40 = vector.load %arg6[%c0_16, %c0_17] : memref<120x32xf32, #tpu.memory_space<vmem>>, vector<120x32xf32>
    %cst_18 = arith.constant dense<0.000000e+00> : vector<120x128xf32>
    %41 = tpu.matmul %40, %39, %cst_18 {dimension_numbers = #tpu.dot_dimension_numbers<[1], [0], [0], [1], [0, 0, 1, 1], [], []>} : vector<120x32xf32>, vector<32x128xf32>, vector<120x128xf32> -> vector<120x128xf32>
    %cst_19 = arith.constant dense<0.000000e+00> : vector<128xf32>
    %42 = vector.multi_reduction <add>, %41, %cst_19 [0] : vector<120x128xf32> to vector<128xf32>
    %43 = vector.shape_cast %42 : vector<128xf32> to vector<1x128xf32>
    %cst_20 = arith.constant 1.200000e+02 : f32
    %44 = vector.broadcast %cst_20 : f32 to vector<1x128xf32>
    %45 = arith.divf %43, %44 : vector<1x128xf32>
    %46 = vector.broadcast %45 : vector<1x128xf32> to vector<120x128xf32>
    %47 = arith.subf %41, %46 : vector<120x128xf32>
    %48 = arith.mulf %47, %47 : vector<120x128xf32>
    %cst_21 = arith.constant dense<0.000000e+00> : vector<128xf32>
    %49 = vector.multi_reduction <add>, %48, %cst_21 [0] : vector<120x128xf32> to vector<128xf32>
    %50 = vector.shape_cast %49 : vector<128xf32> to vector<1x128xf32>
    %cst_22 = arith.constant 1.200000e+02 : f32
    %51 = vector.broadcast %cst_22 : f32 to vector<1x128xf32>
    %52 = arith.divf %50, %51 : vector<1x128xf32>
    %53 = vector.broadcast %45 : vector<1x128xf32> to vector<120x128xf32>
    %54 = arith.subf %41, %53 : vector<120x128xf32>
    %cst_23 = arith.constant 9.99999974E-6 : f32
    %55 = vector.broadcast %cst_23 : f32 to vector<1x128xf32>
    %56 = arith.addf %52, %55 : vector<1x128xf32>
    %57 = math.rsqrt %56 : vector<1x128xf32>
    %58 = vector.broadcast %57 : vector<1x128xf32> to vector<120x128xf32>
    %59 = arith.mulf %54, %58 : vector<120x128xf32>
    %c0_24 = arith.constant 0 : index
    %c0_25 = arith.constant 0 : index
    %60 = vector.load %arg7[%c0_24, %c0_25] : memref<120x1xf32, #tpu.memory_space<vmem>>, vector<120x1xf32>
    %61 = vector.broadcast %60 : vector<120x1xf32> to vector<120x128xf32>
    %62 = arith.mulf %59, %61 : vector<120x128xf32>
    %c0_26 = arith.constant 0 : index
    %c0_27 = arith.constant 0 : index
    %63 = vector.load %arg8[%c0_26, %c0_27] : memref<120x1xf32, #tpu.memory_space<vmem>>, vector<120x1xf32>
    %64 = vector.broadcast %63 : vector<120x1xf32> to vector<120x128xf32>
    %65 = arith.addf %62, %64 : vector<120x128xf32>
    %c0_28 = arith.constant 0 : index
    %c0_29 = arith.constant 0 : index
    %66 = vector.load %arg9[%c0_28, %c0_29] : memref<24x128xf32, #tpu.memory_space<vmem>>, vector<24x128xf32>
    %67 = tpu.concatenate %66, %66, %66, %66, %66 in 0 : vector<24x128xf32>, vector<24x128xf32>, vector<24x128xf32>, vector<24x128xf32>, vector<24x128xf32> -> vector<120x128xf32>
    %68 = arith.addf %65, %67 : vector<120x128xf32>
    %cst_30 = arith.constant 5.000000e-01 : f32
    %69 = vector.broadcast %cst_30 : f32 to vector<120x128xf32>
    %70 = arith.mulf %69, %68 : vector<120x128xf32>
    %cst_31 = arith.constant 0.707106769 : f32
    %71 = vector.broadcast %cst_31 : f32 to vector<120x128xf32>
    %72 = arith.mulf %68, %71 : vector<120x128xf32>
    %73 = math.erf %72 : vector<120x128xf32>
    %cst_32 = arith.constant 1.000000e+00 : f32
    %74 = vector.broadcast %cst_32 : f32 to vector<120x128xf32>
    %75 = arith.addf %74, %73 : vector<120x128xf32>
    %76 = arith.mulf %70, %75 : vector<120x128xf32>
    %c0_33 = arith.constant 0 : index
    %c0_34 = arith.constant 0 : index
    %77 = vector.load %arg10[%c0_33, %c0_34] : memref<120x128xf32, #tpu.memory_space<vmem>>, vector<120x128xf32>
    tpu.vector_store %arg10[%c0_33, %c0_34], %76 {strides = array<i32>} : memref<120x128xf32, #tpu.memory_space<vmem>>, vector<120x128xf32>,
    return
  }
  func.func @transform_0(%arg0: i32) -> (i32, i32) {
    %c0_i32 = arith.constant 0 : i32
    %c0_i32_0 = arith.constant 0 : i32
    return %c0_i32, %arg0 : i32, i32
  }
  func.func @transform_1(%arg0: i32) -> (i32, i32) {
    %c0_i32 = arith.constant 0 : i32
    %c0_i32_0 = arith.constant 0 : i32
    %c0_i32_1 = arith.constant 0 : i32
    return %c0_i32, %c0_i32_0 : i32, i32
  }
  func.func @transform_2(%arg0: i32) -> (i32, i32) {
    %c0_i32 = arith.constant 0 : i32
    %c0_i32_0 = arith.constant 0 : i32
    %c0_i32_1 = arith.constant 0 : i32
    return %c0_i32, %c0_i32_0 : i32, i32
  }
  func.func @transform_3(%arg0: i32) -> (i32, i32) {
    %c0_i32 = arith.constant 0 : i32
    %c0_i32_0 = arith.constant 0 : i32
    %c0_i32_1 = arith.constant 0 : i32
    return %c0_i32, %c0_i32_0 : i32, i32
  }
  func.func @transform_4(%arg0: i32) -> (i32, i32) {
    %c0_i32 = arith.constant 0 : i32
    %c0_i32_0 = arith.constant 0 : i32
    %c0_i32_1 = arith.constant 0 : i32
    return %c0_i32, %c0_i32_0 : i32, i32
  }
  func.func @transform_5(%arg0: i32) -> (i32, i32) {
    %c0_i32 = arith.constant 0 : i32
    %c0_i32_0 = arith.constant 0 : i32
    %c0_i32_1 = arith.constant 0 : i32
    return %c0_i32, %c0_i32_0 : i32, i32
  }
  func.func @transform_6(%arg0: i32) -> (i32, i32) {
    %c0_i32 = arith.constant 0 : i32
    %c0_i32_0 = arith.constant 0 : i32
    %c0_i32_1 = arith.constant 0 : i32
    return %c0_i32, %c0_i32_0 : i32, i32
  }
  func.func @transform_7(%arg0: i32) -> (i32, i32) {
    %c0_i32 = arith.constant 0 : i32
    %c0_i32_0 = arith.constant 0 : i32
    %c0_i32_1 = arith.constant 0 : i32
    return %c0_i32, %c0_i32_0 : i32, i32
  }
  func.func @transform_8(%arg0: i32) -> (i32, i32) {
    %c0_i32 = arith.constant 0 : i32
    %c0_i32_0 = arith.constant 0 : i32
    return %c0_i32, %arg0 : i32, i32
  }
  func.func @transform_9(%arg0: i32) -> (i32, i32) {
    %c0_i32 = arith.constant 0 : i32
    %c0_i32_0 = arith.constant 0 : i32
    return %c0_i32, %arg0 : i32, i32
  }
}

</mosaic_0001>

<bundles_post_ra>
// kernel: tpu_custom_call.1
= control target key start
LH: loop header
LB: loop body
LE: loop exit
PB: predicated region body
PF: predicated region fallthrough
CT: control target
= control target key end

     0   :  { %14 = vsyncpa [#allocation5], 0  ;;  %s2350_s0 = inlined_call_operand.vmem [shape: f32[64,256], index: 0, kind: input, shape index: {}]   ;;  %s2351_s1 = inlined_call_operand.vmem [shape: f32[32,64], index: 1, kind: input, shape index: {}]   ;;  %s2352_s2 = inlined_call_operand.vmem [shape: f32[32,1], index: 2, kind: input, shape index: {}]   ;;  %s2353_s3 = inlined_call_operand.vmem [shape: f32[32,1], index: 3, kind: input, shape index: {}]   ;;  %s2354_s4 = inlined_call_operand.vmem [shape: f32[32,1], index: 4, kind: input, shape index: {}]   ;;  %s2355_s5 = inlined_call_operand.vmem [shape: f32[120,32], index: 5, kind: input, shape index: {}]   ;;  %s2356_s6 = inlined_call_operand.vmem [shape: f32[120,1], index: 6, kind: input, shape index: {}]   ;;  %s2357_s7 = inlined_call_operand.vmem [shape: f32[120,1], index: 7, kind: input, shape index: {}]   ;;  %s2358_s8 = inlined_call_operand.vmem [shape: f32[24,256], index: 8, kind: input, shape index: {}]   ;;  %s2359_s9 = inlined_call_operand.hbm [shape: f32[120,256], index: 9, kind: output, shape index: {}]  }
   0x1   :  { %16 = vsyncpa [#allocation5 + $0x1], 0  ;;  %s1802_s30 = smov 0   ;;  %s1804_s10 = smov 0  }
   0x2   :  { %s1806_s11 = smov 0   ;;  %s1808_s12 = smov 0  }
   0x3 LB: > { %s1422_s13 = sadd.s32 4294967295, %s1742_s12   ;;  %s1423_s14 = sadd.s32 4294967294, %s1742_s12   ;;  %s1742_s12 = sphi %s1808_s12, %s2366_s12   ;;  %s1738_s11 = sphi %s1806_s11, %s2365_s11   ;;  %s1734_s10 = sphi %s1804_s10, %s2364_s10   ;;  %s1730_s30 = sphi %s1802_s30, %s2363_s30  }
   0x4   : > { %s1825_s15 = sadd.s32 1, %s1742_s12   ;;  %s29_s16 = sadd.s32 1, %s1738_s11 }
   0x5   : > { %s26_s17 = ssub.s32 %s1742_s12, %s1825_s15  ;;  %p36_p0 = scmp.ne.s32.totalorder %s1738_s11, %s1734_s10 }
   0x6   : > { %p27_p1 = scmp.eq.s32.totalorder %s26_s17, 0  ;;  %p37_p2 = scmp.eq.s32.totalorder %s1742_s12, 0 }
   0x7   : > { %p239_p3 = scmp.eq.s32.totalorder %s1422_s13, 1  ;;  %p244_p4 = scmp.ne.s32.totalorder %s1734_s10, %s1730_s30 }
   0x8   : > { %s1838_s18 = scalar_select %p27_p1, %s1738_s11, %s29_s16  }
   0x9   : > { %p1840_p5 = por %p37_p2, %p36_p0  ;;  %p1844_p6 = por %p239_p3, %p36_p0 }
   0xa   : > { %p245_p7 = scmp.eq.s32.totalorder %s1423_s14, 1  ;;  %p1425_p9 = scmp.ge.s32.totalorder %s1742_s12, 2 }
   0xc   : > { %p1848_p8 = por %p245_p7, %p244_p4  ;;  %282 = sbr.rel (%p1425_p9) target bundleno = 34 (0x22), region = 44 }
  0x13   : > { %285 = sbr.rel (!%p1840_p5) target bundleno = 27 (0x1b), region = 48  ;;  %s287_s22 = sand.u32 (%p1840_p5), 1, %s1738_s11  }
  0x14   : > { %s1427_s23 = sshll.u32 (%p1840_p5), %s1742_s12, 3  ;;  %s1426_s24 = sshll.u32 (%p1840_p5), %s287_s22, 6 }
  0x15   : > { %s291_s27 = scalar_lea.vmem (%p1840_p5), %s2350_s0, %s1427_s23  ;;  %s289_s28 = scalar_lea.vmem (%p1840_p5), [#allocation2], %s1426_s24 }
  0x16   : > { %v333_v0 = vld [vmem:[%s291_s27] sm:$0xff] (%p1840_p5)  ;;  %v335_v1 = vld [vmem:[%s291_s27 + $0x10] sm:$0xff] (%p1840_p5) }
  0x17   : > { %v337_v2 = vld [vmem:[%s291_s27 + $0x20] sm:$0xff] (%p1840_p5)  ;;  %334 = vst [vmem:[%s289_s28] sm:$0xff] (%p1840_p5), %v333_v0  ;;  %336 = vst [vmem:[%s289_s28 + $0x8] sm:$0xff] (%p1840_p5), %v335_v1  ;;  %v339_v3 = vld [vmem:[%s291_s27 + $0x30] sm:$0xff] (%p1840_p5) }
  0x18   : > { %338 = vst [vmem:[%s289_s28 + $0x10] sm:$0xff] (%p1840_p5), %v337_v2  ;;  %v341_v4 = vld [vmem:[%s291_s27 + $0x40] sm:$0xff] (%p1840_p5)  ;;  %v343_v5 = vld [vmem:[%s291_s27 + $0x50] sm:$0xff] (%p1840_p5)  ;;  %340 = vst [vmem:[%s289_s28 + $0x18] sm:$0xff] (%p1840_p5), %v339_v3 }
  0x19   : > { %342 = vst [vmem:[%s289_s28 + $0x20] sm:$0xff] (%p1840_p5), %v341_v4  ;;  %344 = vst [vmem:[%s289_s28 + $0x28] sm:$0xff] (%p1840_p5), %v343_v5  ;;  %v345_v6 = vld [vmem:[%s291_s27 + $0x60] sm:$0xff] (%p1840_p5)  ;;  %v347_v7 = vld [vmem:[%s291_s27 + $0x70] sm:$0xff] (%p1840_p5) }
  0x1a   : > { %346 = vst [vmem:[%s289_s28 + $0x30] sm:$0xff] %v345_v6  ;;  %348 = vst [vmem:[%s289_s28 + $0x38] sm:$0xff] %v347_v7 }
  0x1b PF: > { %354 = sbr.rel (!%p1840_p5) target bundleno = 34 (0x22), region = 86  ;;  %s356_s29 = sand.u32 (%p1840_p5), 1, %s1738_s11  }
  0x1c   : > { %s1428_s14 = sshll.u32 (%p1840_p5), %s1742_s12, 3  ;;  %s1585_s16 = smul.u32 (%p1840_p5), 24, %s356_s29 }
  0x1d   : > { %s360_s23 = scalar_lea.vmem (%p1840_p5), %s2358_s8, %s1428_s14 }
  0x1e   : > { %v392_v8 = vld [vmem:[%s360_s23] sm:$0xff] (%p1840_p5)  ;;  %v394_v9 = vld [vmem:[%s360_s23 + $0x10] sm:$0xff] (%p1840_p5)  ;;  %s358_s24 = scalar_lea.vmem (%p1840_p5), [#allocation3], %s1585_s16 }
  0x1f   : > { %v396_v10 = vld [vmem:[%s360_s23 + $0x20] sm:$0xff] (%p1840_p5)  ;;  %393 = vst [vmem:[%s358_s24] sm:$0xff] (%p1840_p5), %v392_v8  ;;  %395 = vst [vmem:[%s358_s24 + $0x8] sm:$0xff] (%p1840_p5), %v394_v9 }
  0x20   : > { %397 = vst [vmem:[%s358_s24 + $0x10] sm:$0xff] (%p1840_p5), %v396_v10 }
  0x22 PF: > { %p1429_p10 = scmp.ge.s32.totalorder %s1742_s12, 1  ;;  %p402_p11 = scmp.lt.s32.totalorder %s1742_s12, 3 }
  0x24   : > { %p403_p12 = pnand %p1429_p10, %p402_p11 }
  0x25   : > { %s1872_s19 = sand.u32 (!%p403_p12), 1, %s1734_s10   ;;  %v463_v11 = vld [vmem:[%s2351_s1] sm:$0xff] (!%p403_p12)  ;;  %vm491_vm0 = vcmask (!%p403_p12), 523264   ;;  %v1744_v13 = vmov (!%p403_p12), 0   ;;  %v469_v14 = vld [vmem:[%s2352_s2 + $0x10] sm:$0xff] (!%p403_p12)  ;;  %v468_v15 = vld [vmem:[%s2352_s2 + $0x8] sm:$0xff] (!%p403_p12) }
  0x26   : > { %406 = sbr.rel (%p403_p12) target bundleno = 795 (0x31b), region = 124  ;;  %v467_v12 = vld [vmem:[%s2352_s2] sm:$0xff] (!%p403_p12)  ;;  %s1430_s29 = sshll.u32 (!%p403_p12), %s1872_s19, 6  ;;  %1500 = vmatprep.mubr.msk.f32.mxu0 (!%p403_p12), %vm491_vm0, %v463_v11  ;;  %1634 = vset.pattern.permute.xlu0 (!%p403_p12), %v1744_v13  ;;  %v470_v21 = vld [vmem:[%s2352_s2 + $0x18] sm:$0xff] (!%p403_p12)  ;;  %v625_v27 = vld [vmem:[%s2353_s3 + $0x8] sm:$0xff] (!%p403_p12)  ;;  %v1745_v6 = vmov (!%p403_p12), 0.0|0.0  }
  0x27   : > { %473 = vperm.xlu0 (!%p403_p12), %1634, %v467_v12   ;;  %1635 = vset.pattern.permute.xlu1 (!%p403_p12), %v1744_v13  ;;  %s411_s23 = scalar_lea.vmem (!%p403_p12), [#allocation2], %s1430_s29  ;;  %v624_v25 = vld [vmem:[%s2353_s3] sm:$0xff] (!%p403_p12)  ;;  %v626_v30 = vld [vmem:[%s2353_s3 + $0x10] sm:$0xff] (!%p403_p12)  ;;  %v627_v32 = vld [vmem:[%s2353_s3 + $0x18] sm:$0xff] (!%p403_p12)  ;;  %vm1746_vm1 = vmmov (!%p403_p12), 0   ;;  %vm730_vm2 = vcmask (!%p403_p12), 261120  }
  0x28   : > { %v455_v16 = vld [vmem:[%s411_s23] sm:$0xff] (!%p403_p12)  ;;  %v456_v17 = vld [vmem:[%s411_s23 + $0x8] sm:$0xff] (!%p403_p12)  ;;  %v457_v18 = vld [vmem:[%s411_s23 + $0x10] sm:$0xff] (!%p403_p12)  ;;  %483 = vperm.xlu1 (!%p403_p12), %1635, %v469_v14   ;;  %1581 = vmatprep.subr.bf16.mxu1 (!%p403_p12), %v1745_v6  ;;  %s1586_s28 = smul.u32 (!%p403_p12), 24, %s1872_s19  ;;  %s1450_s22 = sshll.u32 (!%p403_p12), %s1422_s13, 7 }
  0x29   : > { %v1559_v19 = vpack.c.bf16 (!%p403_p12), %v456_v17, %v455_v16  ;;  %v458_v20 = vld [vmem:[%s411_s23 + $0x18] sm:$0xff] (!%p403_p12)  ;;  %v459_v23 = vld [vmem:[%s411_s23 + $0x20] sm:$0xff] (!%p403_p12)  ;;  %v460_v24 = vld [vmem:[%s411_s23 + $0x28] sm:$0xff] (!%p403_p12)  ;;  %s1587_s14 = smul.u32 (!%p403_p12), 120, %s1872_s19  ;;  %s2303_s25 = scalar_lea.hbm (!%p403_p12), %s2359_s9, %s1450_s22 }
  0x2a   : > { %v1563_v22 = vpack.c.bf16 (!%p403_p12), %v458_v20, %v457_v18  ;;  %v1567_v26 = vpack.c.bf16 (!%p403_p12), %v460_v24, %v459_v23  ;;  %v461_v28 = vld [vmem:[%s411_s23 + $0x30] sm:$0xff] (!%p403_p12)  ;;  %v462_v29 = vld [vmem:[%s411_s23 + $0x38] sm:$0xff] (!%p403_p12)  ;;  %v652_v33 = vld [vmem:[%s2354_s4] sm:$0xff] (!%p403_p12)  ;;  %s418_s29 = scalar_lea.vmem (!%p403_p12), [#allocation3], %s1586_s28  ;;  %s1325_s23 = scalar_lea.sflag (!%p403_p12), [#allocation5], %s1872_s19 }
  0x2b   : > { %1560 = vmatprep.subr.bf16.mxu0 (!%p403_p12), %v1559_v19  ;;  %478 = vperm.xlu0 (!%p403_p12), %1634, %v468_v15   ;;  %v1571_v31 = vpack.c.bf16 (!%p403_p12), %v462_v29, %v461_v28  ;;  %v653_v34 = vld [vmem:[%s2354_s4 + $0x8] sm:$0xff] (!%p403_p12)  ;;  %v654_v36 = vld [vmem:[%s2354_s4 + $0x10] sm:$0xff] (!%p403_p12)  ;;  %v655_v38 = vld [vmem:[%s2354_s4 + $0x18] sm:$0xff] (!%p403_p12)  ;;  %s2271_s16 = scalar_lea.vmem (!%p403_p12), [#allocation4], %s1587_s14  ;;  %s1748_s27 = smov (!%p403_p12), [#allocation4]  }
  0x2c   : > { %1562 = vmatpush3.bf16.msra.mxu0 (!%p403_p12), %v1559_v19  ;;  %488 = vperm.xlu1 (!%p403_p12), %1635, %v470_v21   ;;  %v464_v35 = vld [vmem:[%s2351_s1 + $0x8] sm:$0xff] (!%p403_p12)  ;;  %v465_v37 = vld [vmem:[%s2351_s1 + $0x10] sm:$0xff] (!%p403_p12)  ;;  %v466_v39 = vld [vmem:[%s2351_s1 + $0x18] sm:$0xff] (!%p403_p12)  ;;  %s1337_s17 = sshll.u32 (!%p403_p12), %s2271_s16, 4  ;;  %s1684_s28 = sshll.u32 (!%p403_p12), %s1748_s27, 4  ;;  %s2295_s17 = int_to_ptr.vmem [resolvable:$true] %s1337_s17  ;;  %s1685_s28 = int_to_ptr.vmem [resolvable:$false] %s1684_s28 }
  0x2d   : > { %1564 = vmatprep.subr.bf16.mxu0 %v1563_v22  ;;  %v1006_v40 = vld [vmem:[%s2356_s6] sm:$0xff]  ;;  %v1007_v41 = vld [vmem:[%s2356_s6 + $0x8] sm:$0xff]  ;;  %v1008_v42 = vld [vmem:[%s2356_s6 + $0x10] sm:$0xff]  ;;  %s1680_s26 = scalar_lea.vmem %s2295_s17, 1920  ;;  %p1687_p2 = scmp.lt.s32.totalorder %s2295_s17, %s1685_s28 }
  0x2e   : > { %v1009_v43 = vld [vmem:[%s2356_s6 + $0x18] sm:$0xff]  ;;  %v1010_v44 = vld [vmem:[%s2356_s6 + $0x20] sm:$0xff]  ;;  %v1011_v45 = vld [vmem:[%s2356_s6 + $0x28] sm:$0xff]  ;;  %p1681_p13 = scmp.ne.s32.totalorder %s2295_s17, %s1680_s26 }
  0x2f   : > { %630 = vperm.xlu0 %1634, %v624_v25   ;;  %v1012_v46 = vld [vmem:[%s2356_s6 + $0x30] sm:$0xff]  ;;  %v1013_v47 = vld [vmem:[%s2356_s6 + $0x38] sm:$0xff]  ;;  %v1014_v48 = vld [vmem:[%s2356_s6 + $0x40] sm:$0xff] }
  0x30   : > { %1566 = vmatpush3.bf16.msra.mxu0 %v1563_v22  ;;  %635 = vperm.xlu1 %1635, %v625_v27   ;;  %v1015_v49 = vld [vmem:[%s2356_s6 + $0x48] sm:$0xff]  ;;  %v1016_v50 = vld [vmem:[%s2356_s6 + $0x50] sm:$0xff]  ;;  %v1017_v51 = vld [vmem:[%s2356_s6 + $0x58] sm:$0xff]  ;;  %v1747_v22 = vmov 0.0   ;;  %p1682_p0 = pnand %p1681_p13, %p1844_p6 }
  0x31   : > { %1568 = vmatprep.subr.bf16.mxu0 %v1567_v26  ;;  %v1018_v52 = vld [vmem:[%s2356_s6 + $0x60] sm:$0xff]  ;;  %v1019_v53 = vld [vmem:[%s2356_s6 + $0x68] sm:$0xff]  ;;  %v1020_v54 = vld [vmem:[%s2356_s6 + $0x70] sm:$0xff]  ;;  %1529 = vmatprep.mubr.msk.f32.mxu1 %vm1746_vm1, %v1747_v22 }
  0x32   : > { %v1111_v55 = vld [vmem:[%s2357_s7] sm:$0xff]  ;;  %v1112_v56 = vld [vmem:[%s2357_s7 + $0x8] sm:$0xff]  ;;  %v1113_v57 = vld [vmem:[%s2357_s7 + $0x10] sm:$0xff]  ;;  %p1683_p1 = pneg %p1682_p0 }
  0x33   : > { %640 = vperm.xlu0 %1634, %v626_v30   ;;  %v1114_v58 = vld [vmem:[%s2357_s7 + $0x18] sm:$0xff]  ;;  %v1115_v59 = vld [vmem:[%s2357_s7 + $0x20] sm:$0xff]  ;;  %v1116_v60 = vld [vmem:[%s2357_s7 + $0x28] sm:$0xff] }
  0x34   : > { %1570 = vmatpush3.bf16.msra.mxu0 %v1567_v26  ;;  %645 = vperm.xlu1 %1635, %v627_v32   ;;  %v1117_v61 = vld [vmem:[%s2357_s7 + $0x30] sm:$0xff]  ;;  %v1118_v62 = vld [vmem:[%s2357_s7 + $0x38] sm:$0xff]  ;;  %v1119_v63 = vld [vmem:[%s2357_s7 + $0x40] sm:$0xff] }
  0x35   : > { %1572 = vmatprep.subr.bf16.mxu0 %v1571_v31  ;;  %v1120_v0 = vld [vmem:[%s2357_s7 + $0x48] sm:$0xff]  ;;  %v1121_v1 = vld [vmem:[%s2357_s7 + $0x50] sm:$0xff]  ;;  %v1122_v2 = vld [vmem:[%s2357_s7 + $0x58] sm:$0xff] }
  0x36   : > { %v1123_v3 = vld [vmem:[%s2357_s7 + $0x60] sm:$0xff]  ;;  %v1124_v4 = vld [vmem:[%s2357_s7 + $0x68] sm:$0xff]  ;;  %v1125_v5 = vld [vmem:[%s2357_s7 + $0x70] sm:$0xff] }
  0x37   : > { %658 = vperm.xlu0 %1634, %v652_v33  }
  0x38   : > { %1574 = vmatpush3.bf16.msra.mxu0 %v1571_v31  ;;  %663 = vperm.xlu1 %1635, %v653_v34  }
  0x39   : > { %1575 = vmatprep.subr.bf16.mxu0 %v1745_v6 }
  0x3b   : > { %1501 = vmatmul.mubr.msk.f32.vlgmr.msra.gmra.mrb[0].mxu0 %vm491_vm0, %v464_v35  ;;  %668 = vperm.xlu0 %1634, %v654_v36  }
  0x3c   : > { %1503 = vmatprep.mubr.msk.f32.mxu0 %vm491_vm0, %v465_v37  ;;  %673 = vperm.xlu1 %1635, %v655_v38  }
  0x3f   : > { %1504 = vmatmul.mubr.msk.f32.gmra.mrb[2].mxu0 %vm491_vm0, %v466_v39  ;;  %1023 = vperm.xlu0 %1634, %v1006_v40  }
  0x40   : > { %1028 = vperm.xlu1 %1635, %v1007_v41   ;;  %1514 = vmatprep.mubr.msk.f32.mxu0 %vm1746_vm1, %v1747_v22 }
  0x43   : > { %1033 = vperm.xlu0 %1634, %v1008_v42  }
  0x44   : > { %1038 = vperm.xlu1 %1635, %v1009_v43  }
  0x47   : > { %1043 = vperm.xlu0 %1634, %v1010_v44  }
  0x48   : > { %1048 = vperm.xlu1 %1635, %v1011_v45  }
  0x4b   : > { %1053 = vperm.xlu0 %1634, %v1012_v46  }
  0x4c   : > { %1058 = vperm.xlu1 %1635, %v1013_v47  }
  0x4f   : > { %1063 = vperm.xlu0 %1634, %v1014_v48  }
  0x50   : > { %1068 = vperm.xlu1 %1635, %v1015_v49  }
  0x53   : > { %1073 = vperm.xlu0 %1634, %v1016_v50  }
  0x54   : > { %1078 = vperm.xlu1 %1635, %v1017_v51  }
  0x57   : > { %1083 = vperm.xlu0 %1634, %v1018_v52  }
  0x58   : > { %1088 = vperm.xlu1 %1635, %v1019_v53  }
  0x5b   : > { %1093 = vperm.xlu0 %1634, %v1020_v54  }
  0x5c   : > { %1128 = vperm.xlu1 %1635, %v1111_v55  }
  0x5f   : > { %1133 = vperm.xlu0 %1634, %v1112_v56  }
  0x60   : > { %1138 = vperm.xlu1 %1635, %v1113_v57  }
  0x63   : > { %1143 = vperm.xlu0 %1634, %v1114_v58  }
  0x64   : > { %1148 = vperm.xlu1 %1635, %v1115_v59  }
  0x67   : > { %1153 = vperm.xlu0 %1634, %v1116_v60  }
  0x68   : > { %1158 = vperm.xlu1 %1635, %v1117_v61  }
  0x6b   : > { %1163 = vperm.xlu0 %1634, %v1118_v62  }
  0x6c   : > { %1168 = vperm.xlu1 %1635, %v1119_v63  }
  0x6f   : > { %1173 = vperm.xlu0 %1634, %v1120_v0  }
  0x70   : > { %1178 = vperm.xlu1 %1635, %v1121_v1  }
  0x73   : > { %1183 = vperm.xlu0 %1634, %v1122_v2  }
  0x74   : > { %1188 = vperm.xlu1 %1635, %v1123_v3  }
  0x77   : > { %1193 = vperm.xlu0 %1634, %v1124_v4  }
  0x78   : > { %1198 = vperm.xlu1 %1635, %v1125_v5  }
  0xa6   : > { %v474_v7 = vpop.permute.xlu0 %473 }
  0xa7   : > { %v484_v10 = vpop.permute.xlu1 %483 }
  0xaa   : > { %v479_v8 = vpop.permute.xlu0 %478 }
  0xab   : > { %v489_v18 = vpop.permute.xlu1 %488 }
  0xae   : > { %v631_v47 = vpop.permute.xlu0 %630 }
  0xaf   : > { %v636_v48 = vpop.permute.xlu1 %635 }
  0xb2   : > { %v641_v51 = vpop.permute.xlu0 %640 }
  0xb3   : > { %v646_v52 = vpop.permute.xlu1 %645 }
  0xb6   : > { %v659_v53 = vpop.permute.xlu0 %658 }
  0xb7   : > { %v664_v54 = vpop.permute.xlu1 %663 }
  0xba   : > { %v669_v0 = vpop.permute.xlu0 %668 }
  0xbb   : > { %v674_v1 = vpop.permute.xlu1 %673 }
 0x10e   : > { %v1502_v9 = vpop.f32.mrb[0].mxu0 }
 0x10f   : > { %v576_v11 = vadd.f32 %v1502_v9, %v479_v8  ;;  %v570_v12 = vpop.f32.mrb[1].mxu0 }
 0x110   : > { %v571_v13 = vadd.f32 %v570_v12, %v474_v7 }
 0x112   : > { %v589_v14 = vadd.f32 %v576_v11, %v571_v13  ;;  %v1505_v15 = vpop.f32.mrb[2].mxu0 }
 0x113   : > { %v580_v16 = vpop.f32.mrb[3].mxu0  ;;  %v586_v19 = vadd.f32 %v1505_v15, %v489_v18 }
 0x114   : > { %v581_v17 = vadd.f32 %v580_v16, %v484_v10 }
 0x116   : > { %v590_v20 = vadd.f32 %v589_v14, %v581_v17 }
 0x118   : > { %v591_v21 = vadd.f32 %v590_v20, %v586_v19 }
 0x11a   : > { %v592_v23 = vrot.slane %v591_v21, 4 }
 0x11c   : > { %v593_v24 = vadd.f32 %v592_v23, %v591_v21 }
 0x11e   : > { %v594_v25 = vrot.slane %v593_v24, 2 }
 0x120   : > { %v595_v26 = vadd.f32 %v594_v25, %v593_v24 }
 0x122   : > { %v596_v27 = vrot.slane %v595_v26, 1 }
 0x124   : > { %v597_v28 = vadd.f32 %v596_v27, %v595_v26 }
 0x126   : > { %v599_v29 = vmul.f32 0.03125, %v597_v28 }
 0x128   : > { %v600_v30 = vsub.f32 %v571_v13, %v599_v29  ;;  %v601_v31 = vsub.f32 %v576_v11, %v599_v29  ;;  %v602_v32 = vsub.f32 %v581_v17, %v599_v29  ;;  %v603_v33 = vsub.f32 %v586_v19, %v599_v29 }
 0x12a   : > { %v604_v34 = vmul.f32 %v600_v30, %v600_v30  ;;  %v605_v35 = vmul.f32 %v601_v31, %v601_v31  ;;  %v606_v36 = vmul.f32 %v602_v32, %v602_v32  ;;  %v607_v38 = vmul.f32 %v603_v33, %v603_v33 }
 0x12c   : > { %v608_v37 = vadd.f32 %v605_v35, %v604_v34 }
 0x12e   : > { %v609_v39 = vadd.f32 %v608_v37, %v606_v36 }
 0x130   : > { %v610_v40 = vadd.f32 %v609_v39, %v607_v38 }
 0x132   : > { %v611_v41 = vrot.slane %v610_v40, 4 }
 0x134   : > { %v612_v42 = vadd.f32 %v611_v41, %v610_v40 }
 0x136   : > { %v613_v43 = vrot.slane %v612_v42, 2 }
 0x138   : > { %v614_v44 = vadd.f32 %v613_v43, %v612_v42 }
 0x13a   : > { %v615_v45 = vrot.slane %v614_v44, 1 }
 0x13c   : > { %v616_v46 = vadd.f32 %v615_v45, %v614_v44  ;;  %v715_v45 = vld [vmem:[%s2355_s5] sm:$0xff] }
 0x13e   : > { %v617_v49 = vmul.f32 0.03125, %v616_v46  ;;  %v720_v46 = vld [vmem:[%s2355_s5 + $0x28] sm:$0xff] }
 0x140   : > { %v618_v50 = vadd.f32 1e-05, %v617_v49  ;;  %v722_v49 = vld [vmem:[%s2355_s5 + $0x38] sm:$0xff] }
 0x142   : > { %1636 = vrsqrt.f32 %v618_v50  ;;  %v718_v50 = vld [vmem:[%s2355_s5 + $0x18] sm:$0xff] }
 0x14c   : > { %v1637_v55 = vpop.eup %1636 }
 0x14d   : > { %v620_v56 = vmul.f32 %v1637_v55, %v600_v30  ;;  %v621_v57 = vmul.f32 %v1637_v55, %v601_v31  ;;  %v622_v58 = vmul.f32 %v1637_v55, %v602_v32  ;;  %v623_v59 = vmul.f32 %v1637_v55, %v603_v33  ;;  %v726_v55 = vld [vmem:[%s2355_s5 + $0x58] sm:$0xff] }
 0x14f   : > { %v648_v60 = vmul.f32 %v631_v47, %v620_v56  ;;  %v649_v61 = vmul.f32 %v636_v48, %v621_v57  ;;  %v650_v62 = vmul.f32 %v641_v51, %v622_v58  ;;  %v651_v63 = vmul.f32 %v646_v52, %v623_v59  ;;  %v721_v47 = vld [vmem:[%s2355_s5 + $0x30] sm:$0xff]  ;;  %v723_v51 = vld [vmem:[%s2355_s5 + $0x40] sm:$0xff]  ;;  %v728_v57 = vld [vmem:[%s2355_s5 + $0x68] sm:$0xff] }
 0x150   : > { %v717_v48 = vld [vmem:[%s2355_s5 + $0x10] sm:$0xff]  ;;  %v719_v52 = vld [vmem:[%s2355_s5 + $0x20] sm:$0xff] }
 0x151   : > { %v676_v2 = vadd.f32 %v659_v53, %v648_v60  ;;  %v677_v3 = vadd.f32 %v664_v54, %v649_v61  ;;  %v678_v4 = vadd.f32 %v669_v0, %v650_v62  ;;  %v679_v5 = vadd.f32 %v674_v1, %v651_v63  ;;  %v724_v53 = vld [vmem:[%s2355_s5 + $0x48] sm:$0xff]  ;;  %v725_v54 = vld [vmem:[%s2355_s5 + $0x50] sm:$0xff]  ;;  %v727_v56 = vld [vmem:[%s2355_s5 + $0x60] sm:$0xff] }
 0x152   : > { %v729_v58 = vld [vmem:[%s2355_s5 + $0x70] sm:$0xff] }
 0x153   : > { %v680_v7 = vmax.f32 %v676_v2, %v677_v3  ;;  %v681_v8 = vmax.f32 %v678_v4, %v679_v5 }
 0x155   : > { %v682_v9 = vmax.f32 %v680_v7, %v681_v8 }
 0x157   : > { %v683_v10 = vrot.slane %v682_v9, 4 }
 0x159   : > { %v684_v11 = vmax.f32 %v682_v9, %v683_v10 }
 0x15b   : > { %v685_v12 = vrot.slane %v684_v11, 2 }
 0x15d   : > { %v686_v13 = vmax.f32 %v684_v11, %v685_v12 }
 0x15f   : > { %v687_v14 = vrot.slane %v686_v13, 1 }
 0x161   : > { %v688_v15 = vmax.f32 %v686_v13, %v687_v14 }
 0x163   : > { %v689_v16 = vsub.f32 %v676_v2, %v688_v15  ;;  %v690_v17 = vsub.f32 %v677_v3, %v688_v15  ;;  %v691_v18 = vsub.f32 %v678_v4, %v688_v15  ;;  %v692_v19 = vsub.f32 %v679_v5, %v688_v15 }
 0x165   : > { %v693_v20 = vmul.f32 1.442695, %v689_v16  ;;  %v695_v21 = vmul.f32 1.442695, %v690_v17  ;;  %v697_v23 = vmul.f32 1.442695, %v691_v18 }
 0x166   : > { %v699_v24 = vmul.f32 1.442695, %v692_v19 }
 0x167   : > { %1638 = vpow2.f32 %v693_v20 }
 0x168   : > { %1640 = vpow2.f32 %v695_v21 }
 0x169   : > { %1642 = vpow2.f32 %v697_v23 }
 0x16a   : > { %1644 = vpow2.f32 %v699_v24 }
 0x171   : > { %v1639_v25 = vpop.eup %1638 }
 0x172   : > { %v1641_v26 = vpop.eup %1640 }
 0x173   : > { %v701_v27 = vadd.f32 %v1641_v26, %v1639_v25  ;;  %v1643_v28 = vpop.eup %1642 }
 0x174   : > { %v1645_v30 = vpop.eup %1644 }
 0x175   : > { %v702_v29 = vadd.f32 %v1643_v28, %v701_v27 }
 0x177   : > { %v703_v31 = vadd.f32 %v1645_v30, %v702_v29 }
 0x179   : > { %v704_v32 = vrot.slane %v703_v31, 4 }
 0x17b   : > { %v705_v33 = vadd.f32 %v704_v32, %v703_v31 }
 0x17d   : > { %v706_v34 = vrot.slane %v705_v33, 2 }
 0x17f   : > { %v707_v35 = vadd.f32 %v706_v34, %v705_v33 }
 0x181   : > { %v708_v36 = vrot.slane %v707_v35, 1 }
 0x183   : > { %v709_v37 = vadd.f32 %v708_v36, %v707_v35 }
 0x185   : > { %1646 = vrcp.f32 %v709_v37 }
 0x18f   : > { %v1647_v38 = vpop.eup %1646 }
 0x190   : > { %v711_v39 = vmul.f32 %v1647_v38, %v1639_v25  ;;  %v712_v40 = vmul.f32 %v1647_v38, %v1641_v26  ;;  %v713_v41 = vmul.f32 %v1647_v38, %v1643_v28  ;;  %v714_v42 = vmul.f32 %v1647_v38, %v1645_v30 }
 0x192   : > { %v1576_v43 = vpack.c.bf16 %v712_v40, %v711_v39  ;;  %v1579_v44 = vpack.c.bf16 %v714_v42, %v713_v41 }
 0x194   : > { %1577 = vmatpush3.bf16.msra.mxu0 %v1576_v43  ;;  %1583 = vmatpush3.bf16.msra.mxu1 %v1576_v43 }
 0x195   : > { %1578 = vmatprep.subr.bf16.mxu0 %v1745_v6  ;;  %1582 = vmatprep.subr.bf16.mxu1 %v1745_v6  ;;  %v716_v6 = vld [vmem:[%s2355_s5 + $0x8] sm:$0xff] }
 0x198   : > { %1580 = vmatpush3.bf16.msra.mxu0 %v1579_v44  ;;  %1584 = vmatpush3.bf16.msra.mxu1 %v1579_v44 }
 0x19b   : > { %1515 = vmatmul.mubr.msk.f32.vlgmr.msra.gmra.mrb[4].mxu0 %vm730_vm2, %v715_v45  ;;  %1530 = vmatmul.mubr.msk.f32.vlgmr.msra.gmra.mrb[0].mxu1 %vm730_vm2, %v720_v46  ;;  %v2111_v46 = vpop.permute.xlu0 %1023 }
 0x19c   : > { %1517 = vmatprep.mubr.msk.f32.mxu0 %vm1746_vm1, %v1747_v22  ;;  %1532 = vmatprep.mubr.msk.f32.mxu1 %vm1746_vm1, %v1747_v22 }
 0x19f   : > { %1518 = vmatmul.mubr.msk.f32.gmra.mrb[6].mxu0 %vm730_vm2, %v716_v6  ;;  %1533 = vmatmul.mubr.msk.f32.gmra.mrb[2].mxu1 %vm730_vm2, %v721_v47  ;;  %v2113_v47 = vpop.permute.xlu1 %1028 }
 0x1a0   : > { %1520 = vmatprep.mubr.msk.f32.mxu0 %vm1746_vm1, %v1747_v22  ;;  %1535 = vmatprep.mubr.msk.f32.mxu1 %vm1746_vm1, %v1747_v22 }
 0x1a3   : > { %1521 = vmatmul.mubr.msk.f32.gmra.mrb[8].mxu0 %vm730_vm2, %v717_v48  ;;  %1536 = vmatmul.mubr.msk.f32.gmra.mrb[4].mxu1 %vm730_vm2, %v722_v49 }
 0x1a4   : > { %1523 = vmatprep.mubr.msk.f32.mxu0 %vm1746_vm1, %v1747_v22  ;;  %1538 = vmatprep.mubr.msk.f32.mxu1 %vm1746_vm1, %v1747_v22 }
 0x1a7   : > { %1524 = vmatmul.mubr.msk.f32.gmra.mrb[10].mxu0 %vm730_vm2, %v718_v50  ;;  %1539 = vmatmul.mubr.msk.f32.gmra.mrb[6].mxu1 %vm730_vm2, %v723_v51 }
 0x1a8   : > { %1526 = vmatprep.mubr.msk.f32.mxu0 %vm1746_vm1, %v1747_v22  ;;  %1541 = vmatprep.mubr.msk.f32.mxu1 %vm1746_vm1, %v1747_v22 }
 0x1ab   : > { %1527 = vmatmul.mubr.msk.f32.gmra.mrb[12].mxu0 %vm730_vm2, %v719_v52  ;;  %1542 = vmatmul.mubr.msk.f32.gmra.mrb[8].mxu1 %vm730_vm2, %v724_v53 }
 0x1ac   : > { %1544 = vmatprep.mubr.msk.f32.mxu1 %vm1746_vm1, %v1747_v22 }
 0x1af   : > { %1545 = vmatmul.mubr.msk.f32.gmra.mrb[10].mxu1 %vm730_vm2, %v725_v54 }
 0x1b0   : > { %1547 = vmatprep.mubr.msk.f32.mxu1 %vm1746_vm1, %v1747_v22 }
 0x1b3   : > { %1548 = vmatmul.mubr.msk.f32.gmra.mrb[12].mxu1 %vm730_vm2, %v726_v55 }
 0x1b4   : > { %1550 = vmatprep.mubr.msk.f32.mxu1 %vm1746_vm1, %v1747_v22 }
 0x1b7   : > { %1551 = vmatmul.mubr.msk.f32.gmra.mrb[14].mxu1 %vm730_vm2, %v727_v56 }
 0x1b8   : > { %1553 = vmatprep.mubr.msk.f32.mxu1 %vm1746_vm1, %v1747_v22 }
 0x1bb   : > { %1554 = vmatmul.mubr.msk.f32.gmra.mrb[16].mxu1 %vm730_vm2, %v728_v57 }
 0x1bc   : > { %1556 = vmatprep.mubr.msk.f32.mxu1 %vm1746_vm1, %v1747_v22 }
 0x1bf   : > { %1557 = vmatmul.mubr.msk.f32.gmra.mrb[18].mxu1 %vm730_vm2, %v729_v58 }
 0x26e   : > { %v842_v59 = vpop.f32.mrb[4].mxu0  ;;  %v867_v60 = vpop.f32.mrb[0].mxu1 }
 0x26f   : > { %v1516_v61 = vpop.f32.mrb[5].mxu0  ;;  %v1531_v62 = vpop.f32.mrb[1].mxu1 }
 0x272   : > { %v847_v63 = vpop.f32.mrb[6].mxu0  ;;  %v872_v0 = vpop.f32.mrb[2].mxu1 }
 0x273   : > { %v916_v1 = vadd.f32 %v847_v63, %v842_v59  ;;  %v1519_v2 = vpop.f32.mrb[7].mxu0  ;;  %v1534_v3 = vpop.f32.mrb[3].mxu1 }
 0x274   : > { %v2151_v2 = vpop.permute.xlu1 %1038 }
 0x276   : > { %v852_v4 = vpop.f32.mrb[8].mxu0  ;;  %v877_v5 = vpop.f32.mrb[4].mxu1 }
 0x277   : > { %v917_v7 = vadd.f32 %v916_v1, %v852_v4  ;;  %v1522_v8 = vpop.f32.mrb[9].mxu0  ;;  %v1537_v22 = vpop.f32.mrb[5].mxu1 }
 0x278   : > { %v2159_v22 = vpop.permute.xlu1 %1048 }
 0x27a   : > { %v857_v9 = vpop.f32.mrb[10].mxu0  ;;  %v882_v10 = vpop.f32.mrb[6].mxu1 }
 0x27b   : > { %v918_v11 = vadd.f32 %v917_v7, %v857_v9  ;;  %v1525_v12 = vpop.f32.mrb[11].mxu0  ;;  %v1540_v13 = vpop.f32.mrb[7].mxu1 }
 0x27e   : > { %v862_v14 = vpop.f32.mrb[12].mxu0  ;;  %v887_v15 = vpop.f32.mrb[8].mxu1 }
 0x27f   : > { %v919_v16 = vadd.f32 %v918_v11, %v862_v14  ;;  %v1528_v17 = vpop.f32.mrb[13].mxu0  ;;  %v1543_v18 = vpop.f32.mrb[9].mxu1 }
 0x281   : > { %v920_v19 = vadd.f32 %v919_v16, %v867_v60  ;;  %v2169_v16 = vpop.permute.xlu1 %1058 }
 0x282   : > { %v892_v20 = vpop.f32.mrb[10].mxu1 }
 0x283   : > { %v921_v21 = vadd.f32 %v920_v19, %v872_v0  ;;  %v1546_v23 = vpop.f32.mrb[11].mxu1 }
 0x285   : > { %v922_v24 = vadd.f32 %v921_v21, %v877_v5 }
 0x286   : > { %v897_v25 = vpop.f32.mrb[12].mxu1 }
 0x287   : > { %v923_v26 = vadd.f32 %v922_v24, %v882_v10  ;;  %v1549_v27 = vpop.f32.mrb[13].mxu1 }
 0x289   : > { %v924_v28 = vadd.f32 %v923_v26, %v887_v15 }
 0x28a   : > { %v902_v29 = vpop.f32.mrb[14].mxu1 }
 0x28b   : > { %v925_v30 = vadd.f32 %v924_v28, %v892_v20  ;;  %v1552_v31 = vpop.f32.mrb[15].mxu1 }
 0x28d   : > { %v926_v32 = vadd.f32 %v925_v30, %v897_v25 }
 0x28e   : > { %v907_v33 = vpop.f32.mrb[16].mxu1 }
 0x28f   : > { %v927_v34 = vadd.f32 %v926_v32, %v902_v29  ;;  %v1555_v35 = vpop.f32.mrb[17].mxu1 }
 0x291   : > { %v928_v36 = vadd.f32 %v927_v34, %v907_v33 }
 0x292   : > { %v912_v37 = vpop.f32.mrb[18].mxu1 }
 0x293   : > { %v929_v38 = vadd.f32 %v928_v36, %v912_v37  ;;  %v1558_v39 = vpop.f32.mrb[19].mxu1 }
 0x295   : > { %v930_v40 = vrot.slane %v929_v38, 4 }
 0x297   : > { %v931_v41 = vadd.f32 %v930_v40, %v929_v38 }
 0x299   : > { %v932_v42 = vrot.slane %v931_v41, 2 }
 0x29b   : > { %v933_v43 = vadd.f32 %v932_v42, %v931_v41 }
 0x29d   : > { %v934_v44 = vrot.slane %v933_v43, 1 }
 0x29f   : > { %v935_v45 = vadd.f32 %v934_v44, %v933_v43 }
 0x2a1   : > { %v937_v6 = vmul.f32 0.008333334, %v935_v45 }
 0x2a3   : > { %v2115_v48 = vsub.f32 %v842_v59, %v937_v6  ;;  %v2117_v49 = vsub.f32 %v847_v63, %v937_v6  ;;  %v2119_v50 = vsub.f32 %v852_v4, %v937_v6  ;;  %v2121_v51 = vsub.f32 %v857_v9, %v937_v6 }
 0x2a4   : > { %v2123_v52 = vsub.f32 %v862_v14, %v937_v6  ;;  %v2125_v53 = vsub.f32 %v867_v60, %v937_v6  ;;  %v2127_v54 = vsub.f32 %v872_v0, %v937_v6  ;;  %v2129_v55 = vsub.f32 %v877_v5, %v937_v6  ;;  %v2147_v0 = vpop.permute.xlu0 %1033 }
 0x2a5   : > { %v2131_v56 = vsub.f32 %v882_v10, %v937_v6  ;;  %v2133_v57 = vsub.f32 %v887_v15, %v937_v6  ;;  %v2135_v58 = vsub.f32 %v892_v20, %v937_v6  ;;  %v2137_v59 = vsub.f32 %v897_v25, %v937_v6  ;;  %v2179_v25 = vpop.permute.xlu1 %1068 }
 0x2a6   : > { %v2139_v61 = vsub.f32 %v902_v29, %v937_v6  ;;  %v2141_v62 = vsub.f32 %v907_v33, %v937_v6  ;;  %v2143_v63 = vsub.f32 %v912_v37, %v937_v6  ;;  %v953_v60 = vmul.f32 %v2115_v48, %v2115_v48 }
 0x2a7   : > { %v954_v1 = vmul.f32 %v2117_v49, %v2117_v49  ;;  %v955_v3 = vmul.f32 %v2119_v50, %v2119_v50  ;;  %v956_v5 = vmul.f32 %v2121_v51, %v2121_v51  ;;  %v957_v9 = vmul.f32 %v2123_v52, %v2123_v52 }
 0x2a8   : > { %v2157_v8 = vpop.permute.xlu0 %1043  ;;  %v958_v11 = vmul.f32 %v2125_v53, %v2125_v53  ;;  %v959_v13 = vmul.f32 %v2127_v54, %v2127_v54  ;;  %v960_v17 = vmul.f32 %v2129_v55, %v2129_v55  ;;  %v961_v19 = vmul.f32 %v2131_v56, %v2131_v56 }
 0x2a9   : > { %v968_v4 = vadd.f32 %v954_v1, %v953_v60  ;;  %v962_v21 = vmul.f32 %v2133_v57, %v2133_v57  ;;  %v963_v26 = vmul.f32 %v2135_v58, %v2135_v58  ;;  %v964_v28 = vmul.f32 %v2137_v59, %v2137_v59  ;;  %v2189_v33 = vpop.permute.xlu1 %1078 }
 0x2aa   : > { %v965_v30 = vmul.f32 %v2139_v61, %v2139_v61  ;;  %v966_v34 = vmul.f32 %v2141_v62, %v2141_v62  ;;  %v967_v36 = vmul.f32 %v2143_v63, %v2143_v63 }
 0x2ab   : > { %v969_v7 = vadd.f32 %v968_v4, %v955_v3 }
 0x2ac   : > { %v2167_v15 = vpop.permute.xlu0 %1053 }
 0x2ad   : > { %v970_v10 = vadd.f32 %v969_v7, %v956_v5  ;;  %v2197_v40 = vpop.permute.xlu1 %1088 }
 0x2af   : > { %v971_v12 = vadd.f32 %v970_v10, %v957_v9 }
 0x2b0   : > { %v2177_v24 = vpop.permute.xlu0 %1063 }
 0x2b1   : > { %v972_v14 = vadd.f32 %v971_v12, %v958_v11  ;;  %v1129_v45 = vpop.permute.xlu1 %1128 }
 0x2b3   : > { %v973_v18 = vadd.f32 %v972_v14, %v959_v13 }
 0x2b4   : > { %v2187_v32 = vpop.permute.xlu0 %1073 }
 0x2b5   : > { %v974_v20 = vadd.f32 %v973_v18, %v960_v17  ;;  %v1139_v4 = vpop.permute.xlu1 %1138 }
 0x2b7   : > { %v975_v23 = vadd.f32 %v974_v20, %v961_v19 }
 0x2b8   : > { %v2195_v39 = vpop.permute.xlu0 %1083 }
 0x2b9   : > { %v976_v27 = vadd.f32 %v975_v23, %v962_v21  ;;  %v1149_v10 = vpop.permute.xlu1 %1148 }
 0x2bb   : > { %v977_v29 = vadd.f32 %v976_v27, %v963_v26 }
 0x2bc   : > { %v2199_v44 = vpop.permute.xlu0 %1093 }
 0x2bd   : > { %v978_v31 = vadd.f32 %v977_v29, %v964_v28  ;;  %v1159_v12 = vpop.permute.xlu1 %1158 }
 0x2bf   : > { %v979_v35 = vadd.f32 %v978_v31, %v965_v30 }
 0x2c0   : > { %v1134_v3 = vpop.permute.xlu0 %1133 }
 0x2c1   : > { %v980_v37 = vadd.f32 %v979_v35, %v966_v34 }
 0x2c3   : > { %v981_v38 = vadd.f32 %v980_v37, %v967_v36  ;;  %v1218_v37 = vld [vmem:[%s418_s29 + $0x10] sm:$0xff] }
 0x2c4   : > { %v1144_v9 = vpop.permute.xlu0 %1143 }
 0x2c5   : > { %v982_v41 = vrot.slane %v981_v38, 4 }
 0x2c7   : > { %v983_v42 = vadd.f32 %v982_v41, %v981_v38 }
 0x2c8   : > { %v1154_v11 = vpop.permute.xlu0 %1153 }
 0x2c9   : > { %v984_v43 = vrot.slane %v983_v42, 2 }
 0x2cb   : > { %v985_v6 = vadd.f32 %v984_v43, %v983_v42 }
 0x2cc   : > { %v1164_v27 = vpop.permute.xlu0 %1163 }
 0x2cd   : > { %v986_v60 = vrot.slane %v985_v6, 1 }
 0x2cf   : > { %v987_v1 = vadd.f32 %v986_v60, %v985_v6 }
 0x2d0   : > { %v1174_v30 = vpop.permute.xlu0 %1173 }
 0x2d1   : > { %v988_v5 = vmul.f32 0.008333334, %v987_v1 }
 0x2d3   : > { %v989_v7 = vadd.f32 1e-05, %v988_v5 }
 0x2d4   : > { %v1184_v41 = vpop.permute.xlu0 %1183 }
 0x2d5   : > { %1648 = vrsqrt.f32 %v989_v7 }
 0x2df   : > { %v1649_v13 = vpop.eup %1648 }
 0x2e0   : > { %v991_v14 = vmul.f32 %v1649_v13, %v2115_v48  ;;  %v992_v17 = vmul.f32 %v1649_v13, %v2117_v49  ;;  %v993_v18 = vmul.f32 %v1649_v13, %v2119_v50  ;;  %v994_v19 = vmul.f32 %v1649_v13, %v2121_v51  ;;  %v1169_v50 = vpop.permute.xlu1 %1168 }
 0x2e1   : > { %v995_v20 = vmul.f32 %v1649_v13, %v2123_v52  ;;  %v996_v21 = vmul.f32 %v1649_v13, %v2125_v53  ;;  %v997_v23 = vmul.f32 %v1649_v13, %v2127_v54  ;;  %v998_v26 = vmul.f32 %v1649_v13, %v2129_v55 }
 0x2e2   : > { %v999_v28 = vmul.f32 %v1649_v13, %v2131_v56  ;;  %v1000_v48 = vmul.f32 %v1649_v13, %v2133_v57  ;;  %v1001_v49 = vmul.f32 %v1649_v13, %v2135_v58  ;;  %v1002_v29 = vmul.f32 %v1649_v13, %v2137_v59 }
 0x2e3   : > { %v1003_v51 = vmul.f32 %v1649_v13, %v2139_v61  ;;  %v1004_v52 = vmul.f32 %v1649_v13, %v2141_v62  ;;  %v1005_v53 = vmul.f32 %v1649_v13, %v2143_v63  ;;  %v1096_v54 = vmul.f32 %v2111_v46, %v991_v14 }
 0x2e4   : > { %v1097_v55 = vmul.f32 %v2113_v47, %v992_v17  ;;  %v1098_v56 = vmul.f32 %v2147_v0, %v993_v18  ;;  %v1099_v57 = vmul.f32 %v2151_v2, %v994_v19  ;;  %v1100_v58 = vmul.f32 %v2157_v8, %v995_v20  ;;  %v1179_v59 = vpop.permute.xlu1 %1178  ;;  %v1216_v47 = vld [vmem:[%s418_s29] sm:$0xff]  ;;  %v1217_v2 = vld [vmem:[%s418_s29 + $0x8] sm:$0xff]  ;;  %v1194_v17 = vpop.permute.xlu0 %1193  ;;  %s1686_s29 = scalar_lea.vmem %s1685_s28, 3840 }
 0x2e5   : > { %v1101_v31 = vmul.f32 %v2159_v22, %v996_v21  ;;  %v1102_v61 = vmul.f32 %v2167_v15, %v997_v23  ;;  %v1201_v62 = vadd.f32 %v1129_v45, %v1096_v54  ;;  %v1103_v63 = vmul.f32 %v2169_v16, %v998_v26  ;;  %p1688_p3 = scmp.lt.s32.totalorder %s1686_s29, %s1680_s26 }
 0x2e6   : > { %v1202_v34 = vadd.f32 %v1134_v3, %v1097_v55  ;;  %v1203_v35 = vadd.f32 %v1139_v4, %v1098_v56  ;;  %v1204_v46 = vadd.f32 %v1144_v9, %v1099_v57  ;;  %v1104_v0 = vmul.f32 %v2177_v24, %v999_v28 }
 0x2e7   : > { %v1205_v36 = vadd.f32 %v1149_v10, %v1100_v58  ;;  %v1105_v8 = vmul.f32 %v2179_v25, %v1000_v48  ;;  %v1206_v38 = vadd.f32 %v1154_v11, %v1101_v31  ;;  %v1106_v22 = vmul.f32 %v2187_v32, %v1001_v49  ;;  %p1689_p4 = por %p1688_p3, %p1687_p2 }
 0x2e8   : > { %v1107_v15 = vmul.f32 %v2189_v33, %v1002_v29  ;;  %v1207_v42 = vadd.f32 %v1159_v12, %v1102_v61  ;;  %v1219_v16 = vadd.f32 %v1216_v47, %v1201_v62  ;;  %v1189_v43 = vpop.permute.xlu1 %1188  ;;  %v1208_v45 = vadd.f32 %v1164_v27, %v1103_v63 }
 0x2e9   : > { %v1220_v6 = vadd.f32 %v1217_v2, %v1202_v34  ;;  %v1221_v60 = vadd.f32 %v1218_v37, %v1203_v35  ;;  %v2229_v1 = vadd.f32 %v1216_v47, %v1204_v46  ;;  %v1108_v24 = vmul.f32 %v2195_v39, %v1003_v51  ;;  %p1690_p5 = pnand %p1689_p4, %p1683_p1 }
 0x2ea   : > { %v1209_v3 = vadd.f32 %v1169_v50, %v1104_v0  ;;  %v2232_v4 = vadd.f32 %v1217_v2, %v1205_v36  ;;  %v1109_v25 = vmul.f32 %v2197_v40, %v1004_v52  ;;  %v1110_v5 = vmul.f32 %v2199_v44, %v1005_v53 }
 0x2eb   : > { %v1210_v32 = vadd.f32 %v1174_v30, %v1105_v8  ;;  %v2236_v7 = vadd.f32 %v1218_v37, %v1206_v38  ;;  %v1211_v33 = vadd.f32 %v1179_v59, %v1106_v22  ;;  %v1212_v9 = vadd.f32 %v1184_v41, %v1107_v15 }
 0x2ec   : > { %v2238_v10 = vadd.f32 %v1216_v47, %v1207_v42  ;;  %v1249_v11 = vmul.f32 0.70710677, %v1219_v16  ;;  %v2240_v12 = vadd.f32 %v1217_v2, %v1208_v45  ;;  %v1250_v13 = vmul.f32 0.70710677, %v1220_v6  ;;  %v1199_v44 = vpop.permute.xlu1 %1198 }
 0x2ed   : > { %v1251_v14 = vmul.f32 0.70710677, %v1221_v60  ;;  %v1252_v39 = vmul.f32 0.70710677, %v2229_v1  ;;  %v1213_v18 = vadd.f32 %v1189_v43, %v1108_v24  ;;  %v2243_v19 = vadd.f32 %v1218_v37, %v1209_v3 }
 0x2ee   : > { %v1253_v40 = vmul.f32 0.70710677, %v2232_v4  ;;  %1650 = verf.f32 %v1249_v11  ;;  %v1214_v20 = vadd.f32 %v1194_v17, %v1109_v25  ;;  %v2246_v21 = vadd.f32 %v1216_v47, %v1210_v32 }
 0x2ef   : > { %v1254_v23 = vmul.f32 0.70710677, %v2236_v7  ;;  %1652 = verf.f32 %v1250_v13  ;;  %v1215_v26 = vadd.f32 %v1199_v44, %v1110_v5  ;;  %v2249_v27 = vadd.f32 %v1217_v2, %v1211_v33 }
 0x2f0   : > { %v1255_v28 = vmul.f32 0.70710677, %v2238_v10  ;;  %1654 = verf.f32 %v1251_v14  ;;  %v2252_v48 = vadd.f32 %v1218_v37, %v1212_v9  ;;  %v1256_v49 = vmul.f32 0.70710677, %v2240_v12 }
 0x2f1   : > { %1656 = verf.f32 %v1252_v39  ;;  %v2255_v29 = vadd.f32 %v1216_v47, %v1213_v18  ;;  %v1257_v50 = vmul.f32 0.70710677, %v2243_v19  ;;  %v2258_v51 = vadd.f32 %v1217_v2, %v1214_v20 }
 0x2f2   : > { %1658 = verf.f32 %v1253_v40  ;;  %v1258_v52 = vmul.f32 0.70710677, %v2246_v21  ;;  %v2261_v53 = vadd.f32 %v1218_v37, %v1215_v26  ;;  %v1259_v54 = vmul.f32 0.70710677, %v2249_v27 }
 0x2f3   : > { %1660 = verf.f32 %v1254_v23  ;;  %v1260_v55 = vmul.f32 0.70710677, %v2252_v48  ;;  %v1261_v56 = vmul.f32 0.70710677, %v2255_v29  ;;  %v1262_v57 = vmul.f32 0.70710677, %v2258_v51 }
 0x2f4   : > { %1662 = verf.f32 %v1255_v28  ;;  %v1263_v58 = vmul.f32 0.70710677, %v2261_v53  ;;  %v1234_v31 = vmul.f32 0.5, %v1219_v16  ;;  %v1235_v63 = vmul.f32 0.5, %v1220_v6 }
 0x2f5   : > { %1664 = verf.f32 %v1256_v49  ;;  %v1236_v46 = vmul.f32 0.5, %v1221_v60  ;;  %v1237_v2 = vmul.f32 0.5, %v2229_v1  ;;  %v1238_v41 = vmul.f32 0.5, %v2232_v4 }
 0x2f6   : > { %1666 = verf.f32 %v1257_v50  ;;  %v1239_v16 = vmul.f32 0.5, %v2236_v7  ;;  %v1240_v60 = vmul.f32 0.5, %v2238_v10  ;;  %v1241_v4 = vmul.f32 0.5, %v2240_v12 }
 0x2f7   : > { %1668 = verf.f32 %v1258_v52  ;;  %v1242_v7 = vmul.f32 0.5, %v2243_v19  ;;  %v1243_v11 = vmul.f32 0.5, %v2246_v21  ;;  %v1244_v39 = vmul.f32 0.5, %v2249_v27 }
 0x2f8   : > { %v1651_v30 = vpop.eup %1650  ;;  %1670 = verf.f32 %v1259_v54  ;;  %v1245_v19 = vmul.f32 0.5, %v2252_v48  ;;  %v1246_v23 = vmul.f32 0.5, %v2255_v29  ;;  %v1247_v49 = vmul.f32 0.5, %v2258_v51 }
 0x2f9   : > { %v1653_v59 = vpop.eup %1652  ;;  %1672 = verf.f32 %v1260_v55  ;;  %v1279_v61 = vadd.f32 1.0, %v1651_v30  ;;  %v1248_v29 = vmul.f32 0.5, %v2261_v53 }
 0x2fa   : > { %v1655_v62 = vpop.eup %1654  ;;  %1674 = verf.f32 %v1261_v56  ;;  %v1280_v34 = vadd.f32 1.0, %v1653_v59 }
 0x2fb   : > { %v1657_v35 = vpop.eup %1656  ;;  %1676 = verf.f32 %v1262_v57  ;;  %v1281_v47 = vadd.f32 1.0, %v1655_v62  ;;  %v1294_v0 = vmul.f32 %v1279_v61, %v1234_v31 }
 0x2fc   : > { %v1659_v36 = vpop.eup %1658  ;;  %1678 = verf.f32 %v1263_v58  ;;  %v1282_v37 = vadd.f32 1.0, %v1657_v35  ;;  %v1295_v8 = vmul.f32 %v1280_v34, %v1235_v63 }
 0x2fd   : > { %v1661_v38 = vpop.eup %1660  ;;  %v1283_v22 = vadd.f32 1.0, %v1659_v36  ;;  %v1296_v15 = vmul.f32 %v1281_v47, %v1236_v46  ;;  %1309 = vst [vmem:[%s2271_s16] sm:$0xff] %v1294_v0 }
 0x2fe   : > { %v1663_v42 = vpop.eup %1662  ;;  %v1284_v43 = vadd.f32 1.0, %v1661_v38  ;;  %v1297_v45 = vmul.f32 %v1282_v37, %v1237_v2  ;;  %1310 = vst [vmem:[%s2271_s16 + $0x8] sm:$0xff] %v1295_v8 }
 0x2ff   : > { %v1665_v6 = vpop.eup %1664  ;;  %v1285_v1 = vadd.f32 1.0, %v1663_v42  ;;  %v1298_v24 = vmul.f32 %v1283_v22, %v1238_v41  ;;  %1311 = vst [vmem:[%s2271_s16 + $0x10] sm:$0xff] %v1296_v15 }
 0x300   : > { %v1667_v3 = vpop.eup %1666  ;;  %v1286_v25 = vadd.f32 1.0, %v1665_v6  ;;  %v1299_v5 = vmul.f32 %v1284_v43, %v1239_v16  ;;  %1312 = vst [vmem:[%s2271_s16 + $0x18] sm:$0xff] %v1297_v45 }
 0x301   : > { %v1669_v32 = vpop.eup %1668  ;;  %v1287_v33 = vadd.f32 1.0, %v1667_v3  ;;  %v1300_v9 = vmul.f32 %v1285_v1, %v1240_v60  ;;  %1313 = vst [vmem:[%s2271_s16 + $0x20] sm:$0xff] %v1298_v24 }
 0x302   : > { %v1671_v10 = vpop.eup %1670  ;;  %v1288_v13 = vadd.f32 1.0, %v1669_v32  ;;  %v1301_v14 = vmul.f32 %v1286_v25, %v1241_v4  ;;  %1314 = vst [vmem:[%s2271_s16 + $0x28] sm:$0xff] %v1299_v5 }
 0x303   : > { %v1673_v12 = vpop.eup %1672  ;;  %v1289_v17 = vadd.f32 1.0, %v1671_v10  ;;  %v1302_v18 = vmul.f32 %v1287_v33, %v1242_v7  ;;  %1315 = vst [vmem:[%s2271_s16 + $0x30] sm:$0xff] %v1300_v9 }
 0x304   : > { %v1675_v40 = vpop.eup %1674  ;;  %v1290_v44 = vadd.f32 1.0, %v1673_v12  ;;  %v1303_v20 = vmul.f32 %v1288_v13, %v1243_v11  ;;  %1316 = vst [vmem:[%s2271_s16 + $0x38] sm:$0xff] %v1301_v14 }
 0x305   : > { %v1677_v21 = vpop.eup %1676  ;;  %v1291_v26 = vadd.f32 1.0, %v1675_v40  ;;  %v1304_v28 = vmul.f32 %v1289_v17, %v1244_v39  ;;  %1317 = vst [vmem:[%s2271_s16 + $0x40] sm:$0xff] %v1302_v18 }
 0x306   : > { %v1679_v27 = vpop.eup %1678  ;;  %v1292_v48 = vadd.f32 1.0, %v1677_v21  ;;  %v1305_v50 = vmul.f32 %v1290_v44, %v1245_v19  ;;  %1318 = vst [vmem:[%s2271_s16 + $0x48] sm:$0xff] %v1303_v20 }
 0x307   : > { %v1293_v52 = vadd.f32 1.0, %v1679_v27  ;;  %v1306_v54 = vmul.f32 %v1291_v26, %v1246_v23  ;;  %1319 = vst [vmem:[%s2271_s16 + $0x50] sm:$0xff] %v1304_v28 }
 0x308   : > { %v1307_v55 = vmul.f32 %v1292_v48, %v1247_v49  ;;  %1320 = vst [vmem:[%s2271_s16 + $0x58] sm:$0xff] %v1305_v50 }
 0x309   : > { %v1308_v51 = vmul.f32 %v1293_v52, %v1248_v29  ;;  %1321 = vst [vmem:[%s2271_s16 + $0x60] sm:$0xff] %v1306_v54 }
 0x30a   : > { %1322 = vst [vmem:[%s2271_s16 + $0x68] sm:$0xff] %v1307_v55 }
 0x30b   : > { %1323 = vst [vmem:[%s2271_s16 + $0x70] sm:$0xff] %v1308_v51 }
 0x30c   : > { %1693 = shalt.err (!%p1690_p5)
}
 0x30d   : > { %s1694_s14 = scalar_lea.hbm %s2303_s25, 1920  ;;  %s1698_s13 = scalar_lea.hbm %s2359_s9, 3840 }
 0x30e   : > { %p1695_p7 = scmp.ne.s32.totalorder %s2303_s25, %s1694_s14  ;;  %p1699_p12 = scmp.lt.u32.totalorder %s2303_s25, %s2359_s9 }
 0x30f   : > { %p1700_p13 = scmp.lt.u32.totalorder %s1698_s13, %s1694_s14  ;;  %p1702_p1 = scmp.lt.u32.totalorder %s1694_s14, %s2303_s25 }
 0x310   : > { %p1696_p10 = pnand %p1695_p7, %p1844_p6 }
 0x311   : > { %p1701_p0 = por %p1700_p13, %p1699_p12 }
 0x312   : > { %p1697_p11 = pneg %p1696_p10 }
 0x313   : > { %p1703_p2 = por %p1702_p1, %p1701_p0 }
 0x315   : > { %p1704_p3 = pnand %p1703_p2, %p1697_p11 }
 0x317   : > { %1707 = shalt.err (!%p1704_p3)
}
 0x318   : > { %s1749_s26 = smov 128   ;;  %s1750_s28 = smov 256  }
 0x319   : > { %s1751_s29 = smov 8  }
 0x31a   : > { %1588 = dma.vmem_to_hbm [thread:$0]  (%p1844_p6), %s2295_s17, 1920, %s2303_s25, %s1325_s23, %s1749_s26, %s1750_s28, %s1751_s29  }
 0x31b PF: > { %s1352_s16 = sand.u32 1, %s1730_s30   ;;  %p1591_p4 = pnand %p1425_p9, %p1848_p8 }
 0x31c   : > { %s1353_s14 = scalar_lea.sflag [#allocation5], %s1352_s16 }
 0x31d   : > { %1725 = dma.done.wait (!%p1591_p4), %s1353_s14, 1920  }
 0x31e   : > { %1727 = vsyncadd (!%p1591_p4), %s1353_s14, 4294965376  ;;  %p19_p5 = scmp.ge.s32.totalorder %s1825_s15, 4   ;;  %s2363_s30 = smov %s1734_s10 }
 0x31f   : > { %s2364_s10 = smov %s1738_s11  ;;  %s2365_s11 = smov %s1838_s18 }
 0x320   : > { %s2366_s12 = smov %s1825_s15  ;;  %21 = sbr.rel (!%p19_p5) target bundleno = 3 (0x3), region = 180 }
 0x327   :  { %1358 = vsyncpa [#allocation5], 1 }
 0x328   :  { %1360 = vsyncpa [#allocation5 + $0x1], 1 }

</bundles_post_ra>
